<compile_context>
chip_gen: v7x
topology: tpu7x:2x2x1
jax: 0.10.0
libtpu: 0.0.40
codegen_flags: <defaults>
</compile_context>

<pallas_src>
import functools

import jax
import jax.numpy as jnp
import numpy as np
from jax import lax
from jax.experimental import pallas as pl
from jax.experimental.pallas import tpu as pltpu

_NORM_EPS = 1e-6    # F.normalize(p=2, dim=1, eps=1e-6)
_PDIST_EPS = 1e-6   # F.pairwise_distance eps (added to the difference)
_POS_MARGIN = 0.1   # clamp(distance - 0.1, min=0) in the positive branch


def _round_up(x, m):
    return -(-x // m) * m


def _vmem_bytes(tile, d_pad):
    # double-buffered ei/ej input blocks + small stats/out blocks + headroom
    # for the (tile, tile) f32 temporaries (gram, d2, dist, masks, hinge).
    return (2 * 2 * tile * d_pad * 4
            + 2 * (tile * 3 + 3 * tile + 8 * tile) * 4
            + 10 * tile * tile * 4)


def _normalize_stats_kernel(x_ref, lab_ref, e_ref, stats_ref):
    """Row-tiled L2 normalize + per-row stats [||e||^2, sum(e), label]."""
    x = x_ref[...]                                            # (tile, d_pad)
    sq = jnp.sum(x * x, axis=1, keepdims=True)                # (tile, 1)
    inv = lax.rsqrt(jnp.maximum(sq, jnp.float32(_NORM_EPS * _NORM_EPS)))
    e = x * inv                                               # x / max(||x||, eps)
    e_ref[...] = e
    stats_ref[:, 0:1] = jnp.sum(e * e, axis=1, keepdims=True)  # ||e||^2
    stats_ref[:, 1:2] = jnp.sum(e, axis=1, keepdims=True)      # sum(e)
    stats_ref[:, 2:3] = lab_ref[...]                           # label (f32 0/1)


def _pairwise_loss_kernel(ei_ref, ej_ref, si_ref, sj_ref, out_ref, *,
                          tm, tn, n_true, d_true, couple_boost, margin):
    gi = pl.program_id(0)
    tj = pl.program_id(1)
    num_i = pl.num_programs(0)
    # Balanced row-tile remap (pairs row k with row num_i-1-k) so the two
    # v7x TensorCores get similar amounts of lower-triangular work.
    half = gi // 2
    ri = half + (gi - 2 * half) * (num_i - 1 - 2 * half)

    @pl.when(tj == 0)
    def _zero():
        out_ref[...] = jnp.zeros_like(out_ref)

    # Strictly-upper-triangular tile blocks hold no i > j pairs: skip compute.
    # (Their DMAs are also skipped because the j-side index maps are clamped.)
    @pl.when(ri >= tj)
    def _compute():
        ei = ei_ref[...]                    # (tm, d_pad) f32, L2-normalized
        ej = ej_ref[...]                    # (tn, d_pad)
        sq_i = si_ref[:, 0:1]               # (tm, 1)  ||e_i||^2
        s_i = si_ref[:, 1:2]                # (tm, 1)  sum(e_i)
        lab_i = si_ref[:, 2:3]              # (tm, 1)  labels[i]
        sq_j = sj_ref[0:1, :]               # (1, tn)  ||e_j||^2
        s_j = sj_ref[1:2, :]                # (1, tn)  sum(e_j)
        lab_j = sj_ref[2:3, :]              # (1, tn)  labels[j]

        dims = (((1,), (1,)), ((), ()))     # contract the embedding dim
        gram = lax.dot_general(ei, ej, dims,
                               preferred_element_type=jnp.float32,
                               precision=lax.Precision.HIGHEST)

        eps = jnp.float32(_PDIST_EPS)
        # ||e_i - e_j + eps||^2 over the true D columns (padded cols are zero).
        d2 = (sq_i + sq_j - 2.0 * gram
              + 2.0 * eps * (s_i - s_j)
              + eps * eps * jnp.float32(d_true))
        dist = jnp.sqrt(jnp.maximum(d2, 0.0))

        # Narrow iotas; masks come from broadcast compares.
        row_i = ri * tm + lax.broadcasted_iota(jnp.int32, (tm, 1), 0)
        col_j = tj * tn + lax.broadcasted_iota(jnp.int32, (1, tn), 1)
        valid = (row_i > col_j) & (row_i < n_true)      # j < n follows from j < i

        same = lab_i == lab_j
        # For i > j only the labels[i]==1, i==j+1 clause of is_partner can hold.
        partner = (lab_i == jnp.float32(1.0)) & (row_i == col_j + 1)
        boost = jnp.where(partner & jnp.logical_not(same),
                          jnp.float32(couple_boost), jnp.float32(1.0))

        hinge = jnp.where(same, dist - jnp.float32(_POS_MARGIN),
                          jnp.float32(margin) - dist)
        hinge = jnp.where(valid, jnp.maximum(hinge, 0.0), 0.0)
        loss = 0.5 * boost * hinge * hinge               # (tm, tn)

        # vreg-shaped reduction: sum sublane groups -> (8, tn), pure VALU adds
        # on vreg-aligned static slices; accumulate into the resident out block.
        part = loss[0:8, :]
        for a in range(1, tm // 8):
            part = part + loss[a * 8:(a + 1) * 8, :]
        out_ref[...] = out_ref[...] + part


def contrastive_loss_v1(embeddings, labels, *, couple_boost=1.0, margin=1.0,
                        temperature=1.0):
    """embeddings: (N, D) float; labels: (N, 1) or (N,) int/float 0-1 couples."""
    del temperature  # unused in the reference forward pass as well
    n, d = embeddings.shape
    lab = jnp.asarray(labels).reshape(n).astype(jnp.float32)

    d_pad = _round_up(d, 128)
    if n <= 256:
        tile = _round_up(max(n, 8), 8)          # single row tile
    else:
        tile = 256
        # Keep the double-buffered pipeline under v5e's scoped default /
        # v7x's 64 MiB physical VMEM for large D.
        while tile > 128 and _vmem_bytes(tile, d_pad) > 24 * 2 ** 20:
            tile //= 2
    n_pad = _round_up(n, tile)
    num_i = n_pad // tile
    vmem_limit = int(min(56 * 2 ** 20,
                         max(32 * 2 ** 20, 2 * _vmem_bytes(tile, d_pad))))

    x = jnp.pad(embeddings.astype(jnp.float32),
                ((0, n_pad - n), (0, d_pad - d)))
    lab_col = jnp.pad(lab, (0, n_pad - n)).reshape(n_pad, 1)

    # Pass 1: L2 normalization + per-row stats (hoisted out of the tile loop).
    e, stats = pl.pallas_call(
        _normalize_stats_kernel,
        out_shape=(jax.ShapeDtypeStruct((n_pad, d_pad), jnp.float32),
                   jax.ShapeDtypeStruct((n_pad, 3), jnp.float32)),
        grid=(num_i,),
        in_specs=[pl.BlockSpec((tile, d_pad), lambda i: (i, 0)),
                  pl.BlockSpec((tile, 1), lambda i: (i, 0))],
        out_specs=(pl.BlockSpec((tile, d_pad), lambda i: (i, 0)),
                   pl.BlockSpec((tile, 3), lambda i: (i, 0))),
        compiler_params=pltpu.CompilerParams(
            dimension_semantics=("parallel",), vmem_limit_bytes=vmem_limit),
    )(x, lab_col)

    # Tiny (n_pad, 3) -> (3, n_pad) transpose done once in XLA (row layout for
    # the j-indexed stats); negligible next to the O(N^2 D) pairwise pass.
    stats_row = stats.T

    def _row_map(gi):
        half = gi // 2
        return half + (gi - 2 * half) * (num_i - 1 - 2 * half)

    kernel = functools.partial(
        _pairwise_loss_kernel, tm=tile, tn=tile, n_true=n, d_true=d,
        couple_boost=float(couple_boost), margin=float(margin))

    # Pass 2: tiled lower-triangular pairwise hinge loss.
    partials = pl.pallas_call(
        kernel,
        out_shape=jax.ShapeDtypeStruct((num_i * 8, tile), jnp.float32),
        grid=(num_i, num_i),
        in_specs=[
            # e rows for the i tile (constant across j -> fetched once per row)
            pl.BlockSpec((tile, d_pad), lambda i, j: (_row_map(i), 0)),
            # e rows for the j tile, clamped to the diagonal: skipped upper-tri
            # steps revisit the previous block and issue no new DMA.
            pl.BlockSpec((tile, d_pad),
                         lambda i, j: (jnp.minimum(j, _row_map(i)), 0)),
            # per-row stats [||e||^2, sum(e), label], i- and j-indexed
            pl.BlockSpec((tile, 3), lambda i, j: (_row_map(i), 0)),
            pl.BlockSpec((3, tile),
                         lambda i, j: (0, jnp.minimum(j, _row_map(i)))),
        ],
        # Output block index is constant across the j (reduction) axis, so it
        # stays VMEM-resident and acts as the accumulator.
        out_specs=pl.BlockSpec((8, tile), lambda i, j: (_row_map(i), 0)),
        compiler_params=pltpu.CompilerParams(
            dimension_semantics=("parallel", "arbitrary"),
            vmem_limit_bytes=vmem_limit),
    )(e, e, stats, stats_row)

    total = jnp.sum(partials)
    n_comparisons = max(n * (n - 1) // 2, 1)
    return total / jnp.float32(n_comparisons)


def _reference_loss(x, labels, couple_boost=1.0, margin=1.0):
    """Vectorized numpy port of the PyTorch forward (for verification)."""
    x = np.asarray(x, np.float64)
    labels = np.asarray(labels).reshape(-1)
    n = x.shape[0]
    e = x / np.maximum(np.sqrt((x * x).sum(1, keepdims=True)), _NORM_EPS)
    diff = e[:, None, :] - e[None, :, :] + _PDIST_EPS
    dist = np.sqrt((diff * diff).sum(-1))
    same = labels[:, None] == labels[None, :]
    i_idx = np.arange(n)[:, None]
    j_idx = np.arange(n)[None, :]
    lower = i_idx > j_idx
    partner = (((labels[:, None] == 0) & (i_idx == j_idx - 1)) |
               ((labels[:, None] == 1) & (i_idx == j_idx + 1)))
    boost = np.where(partner & ~same, couple_boost, 1.0)
    pos = 0.5 * np.maximum(dist - _POS_MARGIN, 0.0) ** 2
    neg = 0.5 * boost * np.maximum(margin - dist, 0.0) ** 2
    loss = np.where(same, pos, neg)
    total = (loss * lower).sum()
    return total / max(n * (n - 1) // 2, 1)


if __name__ == "__main__":
    couple_boost, margin = 2.0, 1.0
    key = jax.random.PRNGKey(0)
    keys = jax.random.split(key, 3)

    # (N, D): aligned small, padded small, and a multi-tile case that exercises
    # the triangular-clamped DMA path, row remap, accumulation and row padding.
    cases = [(8, 32), (12, 20), (320, 48)]
    for (nc, dc), kc in zip(cases, keys):
        emb = jax.random.normal(kc, (nc, dc), dtype=jnp.float32)
        labv = jnp.tile(jnp.array([0, 1], dtype=jnp.int32), nc // 2).reshape(nc, 1)
        loss = jax.block_until_ready(
            contrastive_loss_v1(emb, labv, couple_boost=couple_boost,
                                margin=margin, temperature=1.0))
        ref = _reference_loss(np.asarray(emb), np.asarray(labv),
                              couple_boost=couple_boost, margin=margin)
        assert np.allclose(float(loss), ref, rtol=1e-4, atol=1e-5), \
            (nc, dc, float(loss), ref)

    print("KERNEL_OK")
</pallas_src>

<mosaic_0001>
module attributes {stable_mosaic.version = 11 : i64} {
  func.func @_normalize_stats_kernel(%arg0: i32, %arg1: memref<8x128xf32, #tpu.memory_space<vmem>>, %arg2: memref<8x1xf32, #tpu.memory_space<vmem>>, %arg3: memref<8x128xf32, #tpu.memory_space<vmem>>, %arg4: memref<8x3xf32, #tpu.memory_space<vmem>>) attributes {dimension_semantics = [#tpu.dimension_semantics<parallel>], iteration_bounds = array<i64: 1>, scalar_prefetch = 0 : i64, scratch_operands = 0 : i64, tpu.core_type = #tpu.core_type<tc>, window_params = [{transform_indices = @transform_0, window_bounds = array<i64: 8, 128>}, {transform_indices = @transform_1, window_bounds = array<i64: 8, 1>}, {transform_indices = @transform_2, window_bounds = array<i64: 8, 128>}, {transform_indices = @transform_3, window_bounds = array<i64: 8, 3>}]} {
    %c0 = arith.constant 0 : index
    %c0_0 = arith.constant 0 : index
    %0 = vector.load %arg1[%c0, %c0_0] : memref<8x128xf32, #tpu.memory_space<vmem>>, vector<8x128xf32>
    %1 = arith.mulf %0, %0 : vector<8x128xf32>
    %cst = arith.constant dense<0.000000e+00> : vector<8xf32>
    %2 = vector.multi_reduction <add>, %1, %cst [1] : vector<8x128xf32> to vector<8xf32>
    %3 = vector.shape_cast %2 : vector<8xf32> to vector<8x1xf32>
    %cst_1 = arith.constant 9.99999996E-13 : f32
    %4 = vector.broadcast %cst_1 : f32 to vector<8x1xf32>
    %5 = arith.maximumf %3, %4 : vector<8x1xf32>
    %6 = math.rsqrt %5 : vector<8x1xf32>
    %7 = vector.broadcast %6 : vector<8x1xf32> to vector<8x128xf32>
    %8 = arith.mulf %0, %7 : vector<8x128xf32>
    %c0_2 = arith.constant 0 : index
    %c0_3 = arith.constant 0 : index
    %9 = vector.load %arg3[%c0_2, %c0_3] : memref<8x128xf32, #tpu.memory_space<vmem>>, vector<8x128xf32>
    tpu.vector_store %arg3[%c0_2, %c0_3], %8 {strides = array<i32>} : memref<8x128xf32, #tpu.memory_space<vmem>>, vector<8x128xf32>,
    %10 = arith.mulf %8, %8 : vector<8x128xf32>
    %cst_4 = arith.constant dense<0.000000e+00> : vector<8xf32>
    %11 = vector.multi_reduction <add>, %10, %cst_4 [1] : vector<8x128xf32> to vector<8xf32>
    %12 = vector.shape_cast %11 : vector<8xf32> to vector<8x1xf32>
    %c0_5 = arith.constant 0 : index
    %c0_6 = arith.constant 0 : index
    %13 = vector.load %arg4[%c0_5, %c0_6] : memref<8x3xf32, #tpu.memory_space<vmem>>, vector<8x1xf32>
    tpu.vector_store %arg4[%c0_5, %c0_6], %12 {strides = array<i32>} : memref<8x3xf32, #tpu.memory_space<vmem>>, vector<8x1xf32>,
    %cst_7 = arith.constant dense<0.000000e+00> : vector<8xf32>
    %14 = vector.multi_reduction <add>, %8, %cst_7 [1] : vector<8x128xf32> to vector<8xf32>
    %15 = vector.shape_cast %14 : vector<8xf32> to vector<8x1xf32>
    %c0_8 = arith.constant 0 : index
    %c1 = arith.constant 1 : index
    %16 = vector.load %arg4[%c0_8, %c1] : memref<8x3xf32, #tpu.memory_space<vmem>>, vector<8x1xf32>
    tpu.vector_store %arg4[%c0_8, %c1], %15 {strides = array<i32>} : memref<8x3xf32, #tpu.memory_space<vmem>>, vector<8x1xf32>,
    %c0_9 = arith.constant 0 : index
    %c0_10 = arith.constant 0 : index
    %17 = vector.load %arg2[%c0_9, %c0_10] : memref<8x1xf32, #tpu.memory_space<vmem>>, vector<8x1xf32>
    %c0_11 = arith.constant 0 : index
    %c2 = arith.constant 2 : index
    %18 = vector.load %arg4[%c0_11, %c2] : memref<8x3xf32, #tpu.memory_space<vmem>>, vector<8x1xf32>
    tpu.vector_store %arg4[%c0_11, %c2], %17 {strides = array<i32>} : memref<8x3xf32, #tpu.memory_space<vmem>>, vector<8x1xf32>,
    return
  }
  func.func @transform_0(%arg0: i32) -> (i32, i32) {
    %c0_i32 = arith.constant 0 : i32
    %c0_i32_0 = arith.constant 0 : i32
    return %arg0, %c0_i32 : i32, i32
  }
  func.func @transform_1(%arg0: i32) -> (i32, i32) {
    %c0_i32 = arith.constant 0 : i32
    %c0_i32_0 = arith.constant 0 : i32
    return %arg0, %c0_i32 : i32, i32
  }
  func.func @transform_2(%arg0: i32) -> (i32, i32) {
    %c0_i32 = arith.constant 0 : i32
    %c0_i32_0 = arith.constant 0 : i32
    return %arg0, %c0_i32 : i32, i32
  }
  func.func @transform_3(%arg0: i32) -> (i32, i32) {
    %c0_i32 = arith.constant 0 : i32
    %c0_i32_0 = arith.constant 0 : i32
    return %arg0, %c0_i32 : i32, i32
  }
}

</mosaic_0001>

<bundles_post_ra>
// kernel: tpu_custom_call.1
= control target key start
LH: loop header
LB: loop body
LE: loop exit
PB: predicated region body
PF: predicated region fallthrough
CT: control target
= control target key end

     0   :  { %s133_s0 = inlined_call_operand.vmem [shape: f32[8,128], index: 0, kind: input, shape index: {}]   ;;  %s134_s1 = inlined_call_operand.vmem [shape: f32[8,1], index: 1, kind: input, shape index: {}]   ;;  %s135_s2 = inlined_call_operand.hbm [shape: f32[8,128], index: 2, kind: output, shape index: {0}]   ;;  %s136_s3 = inlined_call_operand.vmem [shape: f32[8,3], index: 3, kind: output, shape index: {1}]  }
   0x1   :  { %v14_v0 = vld [vmem:[%s133_s0] sm:$0xff] }
   0x2   :  { %9 = vsyncpa [#allocation3], 0  ;;  %v15_v1 = vmul.f32 %v14_v0, %v14_v0  ;;  %v31_v7 = vld [vmem:[%s134_s1] sm:$0xff]  ;;  %s84_s16 = smov [#allocation2]   ;;  %s85_s18 = smov 2  }
   0x3   :  { %s44_s17 = sshll.u32 %s84_s16, 4  ;;  %s45_s17 = int_to_ptr.vmem [resolvable:$true] %s44_s17 }
   0x4   :  { %16 = vadd.xlane.f32.xlu0 %v15_v1  ;;  %s60_s0 = scalar_lea.vmem %s45_s17, 128  ;;  %p65_p1 = scmp.lt.s32.totalorder %s45_s17, %s45_s17 }
   0x5   :  { %p61_p0 = scmp.ne.s32.totalorder %s45_s17, %s60_s0  ;;  %p66_p2 = scmp.lt.s32.totalorder %s60_s0, %s60_s0 }
   0x7   :  { %p67_p3 = por %p66_p2, %p65_p1 }
   0x9   :  { %p68_p4 = pnand %p67_p3, %p61_p0 }
  0x91   :  { %v17_v2 = vpop.xlane.xlu0 %16 }
  0x92   :  { %v18_v3 = vmax.f32 %v17_v2, 1e-12 }
  0x94   :  { %58 = vrsqrt.f32 %v18_v3 }
  0x9e   :  { %v59_v4 = vpop.eup %58 }
  0x9f   :  { %v20_v5 = vmul.f32 %v59_v4, %v14_v0 }
  0xa1   :  { %27 = vadd.xlane.f32.xlu1 %v20_v5  ;;  %21 = vst [vmem:[#allocation2] sm:$0xff] %v20_v5  ;;  %v22_v6 = vmul.f32 %v20_v5, %v20_v5 }
  0xa3   :  { %23 = vadd.xlane.f32.xlu0 %v22_v6 }
  0xb2   :  { %33 = vrot.lane.b32.xlu1 %v31_v7, %s85_s18 }
  0xb3   :  { %71 = shalt.err (!%p68_p4)
}
  0xb4   :  { %s72_s21 = scalar_lea.hbm %s135_s2, 128 }
  0xb5   :  { %p73_p5 = scmp.ne.s32.totalorder %s135_s2, %s72_s21  ;;  %p76_p6 = scmp.lt.u32.totalorder %s72_s21, %s135_s2 }
  0xb7   :  { %p78_p7 = pnand %p76_p6, %p73_p5 }
  0xb9   :  { %81 = shalt.err (!%p78_p7)
}
  0xba   :  { %47 = dma.vmem_to_hbm [thread:$0]  %s45_s17, 128, %s135_s2, [#allocation3]   ;;  %vm25_vm0 = vcmask 7168   ;;  %vm29_vm1 = vcmask 15368   ;;  %vm36_vm2 = vcmask 23568  }
 0x12e   :  { %v28_v8 = vpop.xlane.xlu1 %27 }
 0x130   :  { %v24_v9 = vpop.xlane.xlu0 %23 }
 0x131   :  { %26 = vst.msk [vmem:[%s136_s3] sm:$0xff] %vm25_vm0, %v24_v9 }
 0x132   :  { %30 = vst.msk [vmem:[%s136_s3] sm:$0xff] %vm29_vm1, %v28_v8  ;;  %v34_v10 = vpop.permute.xlu1 %33 }
 0x133   :  { %37 = vst.msk [vmem:[%s136_s3] sm:$0xff] %vm36_vm2, %v34_v10 }
 0x134   :  { %82 = dma.done.wait [#allocation3], 128  }
 0x135   :  { %83 = vsyncadd [#allocation3], 4294967168 }
 0x136   :  { %55 = vsyncpa [#allocation3], 1 }

</bundles_post_ra>
